<compile_context>
chip_gen: v6e
topology: v6e:2x2x1
jax: 0.10.0
libtpu: 0.0.40
codegen_flags: <defaults>
</compile_context>

<pallas_src>
import functools

import jax
import jax.numpy as jnp
from jax import lax
from jax.experimental import pallas as pl
from jax.experimental.pallas import tpu as pltpu


def _log_sigmoid(x):
    # numerically stable: log sigmoid(x) = min(x, 0) - log(1 + exp(-|x|))
    return jnp.minimum(x, 0.0) - jnp.log(1.0 + jnp.exp(-jnp.abs(x)))


def _nce_kernel(len_ref, ctx_ref, tgt_ref, w_ref, b_ref, loss_ref, cnt_ref,
                *, neg_shift):
    """One grid step == one prediction head k (prediction offset k+1).

    context / target / length have constant index_maps, so they are fetched
    into VMEM once and reused across all K grid steps; everything per-head is
    derived in-kernel.
    """
    B, T, H = ctx_ref.shape
    D = w_ref.shape[-1]
    kk = pl.program_id(0) + 1              # prediction offset k+1 (i32 scalar)

    # ---- prediction head on the MXU: bf16 inputs, f32 accumulation ----------
    w = w_ref[...].astype(jnp.bfloat16)                              # (H, D)
    b = b_ref[...]                                                   # (1, D) f32
    if T % 8 == 0:
        # Flatten (B, T) into one M dimension: a single (B*T, H) x (H, D)
        # matmul fills the systolic array far better than B tiny batched ones.
        ctx = ctx_ref[...].reshape(B * T, H).astype(jnp.bfloat16)
        pred = jnp.dot(ctx, w, preferred_element_type=jnp.float32)   # (B*T, D)
        pred = (pred + b).reshape(B, T, D)
    else:
        ctx = ctx_ref[...].astype(jnp.bfloat16)
        pred = jnp.einsum("bth,hd->btd", ctx, w,
                          preferred_element_type=jnp.float32) + b    # (B, T, D)

    tgt = tgt_ref[...]                                               # (B, T, D) f32

    # ---- pairwise scores g[b, t, u] = pred[b, t, :] . tgt[b, u, :] (MXU) ----
    # The positive score for head k is the (k+1)-th superdiagonal of g and the
    # negative score is the wrapped neg_shift diagonal, both selected with
    # in-kernel iota masks; no shifted copies of `target` ever touch HBM.
    # TODO(synk): for long sequences replace this T x T score matrix with a
    # dynamic pltpu.roll of `tgt` plus a time-tiled grid to save MXU flops.
    g = jnp.einsum("btd,bud->btu", pred, tgt,
                   preferred_element_type=jnp.float32)               # (B, T, T)

    t_io = lax.broadcasted_iota(jnp.int32, (T, T), 0)                # row t
    u_io = lax.broadcasted_iota(jnp.int32, (T, T), 1)                # col u
    pos_sel = u_io == t_io + kk                                      # u == t+k+1
    neg_col = jnp.where(t_io + neg_shift >= T,
                        t_io + neg_shift - T, t_io + neg_shift)      # (t+shift)%T
    neg_sel = u_io == neg_col

    pos_score = jnp.sum(jnp.where(pos_sel[None, :, :], g, 0.0), axis=-1)  # (B, T)
    neg_score = jnp.sum(jnp.where(neg_sel[None, :, :], g, 0.0), axis=-1)  # (B, T)

    # ---- validity mask built in-kernel from `length` (no K*B*T mask DMA) ----
    t_b = lax.broadcasted_iota(jnp.int32, (B, T), 1)
    mask = ((t_b + kk) < len_ref[...]).astype(jnp.float32)           # (B, T)

    # ---- binary NCE loss, masked reduction ----------------------------------
    loss = -(_log_sigmoid(pos_score) + _log_sigmoid(-neg_score))     # (B, T)
    loss_ref[...] = jnp.sum(loss * mask).reshape(1, 1, 1)
    cnt_ref[...] = jnp.sum(mask).reshape(1, 1, 1)


def count_nce_loss(context, target, neg_shift, length, weights, biases):
    """CPC NCE loss. context: (B, T, H); target: (B, T, D); weights: (K, H, D)."""
    B, T, H = context.shape
    K, _, D = weights.shape

    neg_shift = int(neg_shift) % T                      # static at trace time
    length2 = jnp.asarray(length, jnp.int32).reshape(B, 1)
    biases3 = biases.reshape(K, 1, D)

    kernel = functools.partial(_nce_kernel, neg_shift=neg_shift)
    loss_sums, counts = pl.pallas_call(
        kernel,
        out_shape=(
            jax.ShapeDtypeStruct((K, 1, 1), jnp.float32),
            jax.ShapeDtypeStruct((K, 1, 1), jnp.float32),
        ),
        grid_spec=pltpu.PrefetchScalarGridSpec(
            num_scalar_prefetch=0,
            grid=(K,),
            in_specs=[
                pl.BlockSpec((B, 1), lambda k: (0, 0)),            # length   (once)
                pl.BlockSpec((B, T, H), lambda k: (0, 0, 0)),      # context  (once)
                pl.BlockSpec((B, T, D), lambda k: (0, 0, 0)),      # target   (once)
                pl.BlockSpec((None, H, D), lambda k: (k, 0, 0)),   # W_k  (squeezed)
                pl.BlockSpec((None, 1, D), lambda k: (k, 0, 0)),   # b_k  (squeezed)
            ],
            out_specs=[
                pl.BlockSpec((1, 1, 1), lambda k: (k, 0, 0)),
                pl.BlockSpec((1, 1, 1), lambda k: (k, 0, 0)),
            ],
        ),
        compiler_params=pltpu.CompilerParams(
            # Each head writes its own output block -> K is trivially parallel
            # (2x on v7x's two TensorCores, neutral on v5e/v6e).
            dimension_semantics=("parallel",),
            vmem_limit_bytes=64 * 1024 * 1024,
        ),
    )(length2, context, target, weights, biases3)

    # TODO(synk): for realistic (T, D) add a second "arbitrary" grid axis that
    # tiles time with scratch accumulators so blocks fit v7x's 64 MiB VMEM.
    per_k = loss_sums[:, 0, 0] / jnp.maximum(counts[:, 0, 0], 1.0)
    return jnp.mean(per_k)


class CPC:
    """JAX/Pallas port of the PyTorch CPC module."""

    def __init__(self, input_dim, hidden_dim, prediction_num=12, key=None):
        self.input_dim = input_dim
        self.hidden_dim = hidden_dim
        self.prediction_num = prediction_num
        if key is None:
            key = jax.random.PRNGKey(42)
        kw, kb = jax.random.split(key)
        # CountNCELoss(hidden_dim, hidden_dim): K linear heads hidden -> hidden
        scale = 1.0 / jnp.sqrt(jnp.float32(hidden_dim))
        self.weights = (jax.random.normal(
            kw, (prediction_num, hidden_dim, hidden_dim), jnp.float32) * scale)
        self.biases = (jax.random.normal(
            kb, (prediction_num, hidden_dim), jnp.float32) * scale)

    def __call__(self, context, length, neg_shift, train=True):
        if train:
            nce = count_nce_loss(context, context, neg_shift, length,
                                 self.weights, self.biases)
            return (nce, None)
        else:
            return (None, context)


if __name__ == "__main__":
    # small, module-consistent shapes
    B, T, H = 2, 16, 32
    prediction_num = 4
    neg_shift = 5

    key = jax.random.PRNGKey(0)
    k_ctx, k_params = jax.random.split(key)
    context = jax.random.normal(k_ctx, (B, T, H), jnp.float32)
    length = jnp.array([16, 12], dtype=jnp.int32)

    model = CPC(input_dim=H, hidden_dim=H, prediction_num=prediction_num,
                key=k_params)

    nce_loss, _ = model(context, length, neg_shift, train=True)
    nce_loss = jax.block_until_ready(nce_loss)

    # eval path sanity
    _, ctx_out = model(context, length, neg_shift, train=False)
    jax.block_until_ready(ctx_out)

    assert nce_loss.shape == ()
    assert bool(jnp.isfinite(nce_loss))
    print("KERNEL_OK")
</pallas_src>

<mosaic_0001>
module attributes {stable_mosaic.version = 11 : i64} {
  func.func @_nce_kernel(%arg0: i32, %arg1: memref<2x1xi32, #tpu.memory_space<vmem>>, %arg2: memref<2x16x32xf32, #tpu.memory_space<vmem>>, %arg3: memref<2x16x32xf32, #tpu.memory_space<vmem>>, %arg4: memref<1x32x32xf32, #tpu.memory_space<vmem>>, %arg5: memref<1x1x32xf32, #tpu.memory_space<vmem>>, %arg6: memref<1x1x1xf32, #tpu.memory_space<vmem>>, %arg7: memref<1x1x1xf32, #tpu.memory_space<vmem>>) attributes {dimension_semantics = [#tpu.dimension_semantics<parallel>], iteration_bounds = array<i64: 4>, scalar_prefetch = 0 : i64, scratch_operands = 0 : i64, tpu.core_type = #tpu.core_type<tc>, window_params = [{pipeline_mode = #tpu.pipeline_mode<synchronous>, transform_indices = @transform_0, window_bounds = array<i64: 2, 1>}, {pipeline_mode = #tpu.pipeline_mode<synchronous>, transform_indices = @transform_1, window_bounds = array<i64: 2, 16, 32>}, {pipeline_mode = #tpu.pipeline_mode<synchronous>, transform_indices = @transform_2, window_bounds = array<i64: 2, 16, 32>}, {transform_indices = @transform_3, window_bounds = array<i64: 1, 32, 32>}, {transform_indices = @transform_4, window_bounds = array<i64: 1, 1, 32>}, {transform_indices = @transform_5, window_bounds = array<i64: 1, 1, 1>}, {transform_indices = @transform_6, window_bounds = array<i64: 1, 1, 1>}]} {
    %c1_i32 = arith.constant 1 : i32
    %0 = arith.addi %arg0, %c1_i32 : i32
    %c0 = arith.constant 0 : index
    %c0_0 = arith.constant 0 : index
    %c0_1 = arith.constant 0 : index
    %1 = vector.load %arg4[%c0, %c0_0, %c0_1] : memref<1x32x32xf32, #tpu.memory_space<vmem>>, vector<1x32x32xf32>
    %2 = vector.shape_cast %1 : vector<1x32x32xf32> to vector<32x32xf32>
    %3 = arith.truncf %2 : vector<32x32xf32> to vector<32x32xbf16>
    %c0_2 = arith.constant 0 : index
    %c0_3 = arith.constant 0 : index
    %c0_4 = arith.constant 0 : index
    %4 = vector.load %arg5[%c0_2, %c0_3, %c0_4] : memref<1x1x32xf32, #tpu.memory_space<vmem>>, vector<1x1x32xf32>
    %5 = vector.shape_cast %4 : vector<1x1x32xf32> to vector<1x32xf32>
    %c0_5 = arith.constant 0 : index
    %c0_6 = arith.constant 0 : index
    %c0_7 = arith.constant 0 : index
    %6 = vector.load %arg2[%c0_5, %c0_6, %c0_7] : memref<2x16x32xf32, #tpu.memory_space<vmem>>, vector<2x16x32xf32>
    %7 = vector.shape_cast %6 : vector<2x16x32xf32> to vector<32x32xf32>
    %8 = arith.truncf %7 : vector<32x32xf32> to vector<32x32xbf16>
    %cst = arith.constant dense<0.000000e+00> : vector<32x32xf32>
    %9 = tpu.matmul %8, %3, %cst {dimension_numbers = #tpu.dot_dimension_numbers<[1], [0], [0], [1], [0, 0, 1, 1], [], []>} : vector<32x32xbf16>, vector<32x32xbf16>, vector<32x32xf32> -> vector<32x32xf32>
    %10 = vector.broadcast %5 : vector<1x32xf32> to vector<32x32xf32>
    %11 = arith.addf %9, %10 : vector<32x32xf32>
    %12 = vector.shape_cast %11 : vector<32x32xf32> to vector<2x16x32xf32>
    %c0_8 = arith.constant 0 : index
    %c0_9 = arith.constant 0 : index
    %c0_10 = arith.constant 0 : index
    %13 = vector.load %arg3[%c0_8, %c0_9, %c0_10] : memref<2x16x32xf32, #tpu.memory_space<vmem>>, vector<2x16x32xf32>
    "tpu.trace_start"() <{level = 10 : i32, message = "btd,bud->btu"}> : () -> ()
    %cst_11 = arith.constant dense<0.000000e+00> : vector<2x16x16xf32>
    %14 = tpu.matmul %12, %13, %cst_11 {dimension_numbers = #tpu.dot_dimension_numbers<[2], [2], [1], [1], [0, 0, 0, 1, 1, 1], [0], [0]>} : vector<2x16x32xf32>, vector<2x16x32xf32>, vector<2x16x16xf32> -> vector<2x16x16xf32>
    "tpu.trace_stop"() : () -> ()
    %15 = tpu.iota {dimensions = array<i32: 0>} : vector<16x16xi32>
    %16 = tpu.iota {dimensions = array<i32: 1>} : vector<16x16xi32>
    %17 = vector.broadcast %0 : i32 to vector<16x16xi32>
    %18 = arith.addi %15, %17 : vector<16x16xi32>
    %19 = arith.cmpi eq, %16, %18 : vector<16x16xi32>
    %c5_i32 = arith.constant 5 : i32
    %20 = vector.broadcast %c5_i32 : i32 to vector<16x16xi32>
    %21 = arith.addi %15, %20 : vector<16x16xi32>
    %c16_i32 = arith.constant 16 : i32
    %22 = vector.broadcast %c16_i32 : i32 to vector<16x16xi32>
    %23 = arith.cmpi sge, %21, %22 : vector<16x16xi32>
    %c5_i32_12 = arith.constant 5 : i32
    %24 = vector.broadcast %c5_i32_12 : i32 to vector<16x16xi32>
    %25 = arith.addi %15, %24 : vector<16x16xi32>
    %c16_i32_13 = arith.constant 16 : i32
    %26 = vector.broadcast %c16_i32_13 : i32 to vector<16x16xi32>
    %27 = arith.subi %25, %26 : vector<16x16xi32>
    %c5_i32_14 = arith.constant 5 : i32
    %28 = vector.broadcast %c5_i32_14 : i32 to vector<16x16xi32>
    %29 = arith.addi %15, %28 : vector<16x16xi32>
    %30 = arith.select %23, %27, %29 : vector<16x16xi1>, vector<16x16xi32>
    %31 = arith.cmpi eq, %16, %30 : vector<16x16xi32>
    %32 = vector.shape_cast %19 : vector<16x16xi1> to vector<1x16x16xi1>
    %cst_15 = arith.constant 0.000000e+00 : f32
    %33 = vector.shape_cast %32 : vector<1x16x16xi1> to vector<1x16x16xi1>
    %34 = vector.broadcast %33 : vector<1x16x16xi1> to vector<2x16x16xi1>
    %35 = vector.broadcast %cst_15 : f32 to vector<2x16x16xf32>
    %36 = arith.select %34, %14, %35 : vector<2x16x16xi1>, vector<2x16x16xf32>
    %cst_16 = arith.constant dense<0.000000e+00> : vector<2x16xf32>
    %37 = vector.multi_reduction <add>, %36, %cst_16 [2] : vector<2x16x16xf32> to vector<2x16xf32>
    %38 = vector.shape_cast %31 : vector<16x16xi1> to vector<1x16x16xi1>
    %cst_17 = arith.constant 0.000000e+00 : f32
    %39 = vector.shape_cast %38 : vector<1x16x16xi1> to vector<1x16x16xi1>
    %40 = vector.broadcast %39 : vector<1x16x16xi1> to vector<2x16x16xi1>
    %41 = vector.broadcast %cst_17 : f32 to vector<2x16x16xf32>
    %42 = arith.select %40, %14, %41 : vector<2x16x16xi1>, vector<2x16x16xf32>
    %cst_18 = arith.constant dense<0.000000e+00> : vector<2x16xf32>
    %43 = vector.multi_reduction <add>, %42, %cst_18 [2] : vector<2x16x16xf32> to vector<2x16xf32>
    %44 = tpu.iota {dimensions = array<i32: 1>} : vector<2x16xi32>
    %45 = vector.broadcast %0 : i32 to vector<2x16xi32>
    %46 = arith.addi %44, %45 : vector<2x16xi32>
    %c0_19 = arith.constant 0 : index
    %c0_20 = arith.constant 0 : index
    %47 = vector.load %arg1[%c0_19, %c0_20] : memref<2x1xi32, #tpu.memory_space<vmem>>, vector<2x1xi32>
    %48 = vector.broadcast %47 : vector<2x1xi32> to vector<2x16xi32>
    %49 = arith.cmpi slt, %46, %48 : vector<2x16xi32>
    %50 = arith.extui %49 : vector<2x16xi1> to vector<2x16xi32>
    %51 = arith.sitofp %50 : vector<2x16xi32> to vector<2x16xf32>
    %cst_21 = arith.constant 0.000000e+00 : f32
    %52 = vector.broadcast %cst_21 : f32 to vector<2x16xf32>
    %53 = arith.minimumf %37, %52 : vector<2x16xf32>
    %54 = math.absf %37 : vector<2x16xf32>
    %cst_22 = arith.constant 0.000000e+00 : f32
    %55 = vector.broadcast %cst_22 : f32 to vector<2x16xf32>
    %56 = arith.subf %55, %54 : vector<2x16xf32>
    %57 = math.exp %56 : vector<2x16xf32>
    %cst_23 = arith.constant 1.000000e+00 : f32
    %58 = vector.broadcast %cst_23 : f32 to vector<2x16xf32>
    %59 = arith.addf %58, %57 : vector<2x16xf32>
    %60 = math.log %59 : vector<2x16xf32>
    %61 = arith.subf %53, %60 : vector<2x16xf32>
    %cst_24 = arith.constant 0.000000e+00 : f32
    %62 = vector.broadcast %cst_24 : f32 to vector<2x16xf32>
    %63 = arith.subf %62, %43 : vector<2x16xf32>
    %cst_25 = arith.constant 0.000000e+00 : f32
    %64 = vector.broadcast %cst_25 : f32 to vector<2x16xf32>
    %65 = arith.minimumf %63, %64 : vector<2x16xf32>
    %66 = math.absf %63 : vector<2x16xf32>
    %cst_26 = arith.constant 0.000000e+00 : f32
    %67 = vector.broadcast %cst_26 : f32 to vector<2x16xf32>
    %68 = arith.subf %67, %66 : vector<2x16xf32>
    %69 = math.exp %68 : vector<2x16xf32>
    %cst_27 = arith.constant 1.000000e+00 : f32
    %70 = vector.broadcast %cst_27 : f32 to vector<2x16xf32>
    %71 = arith.addf %70, %69 : vector<2x16xf32>
    %72 = math.log %71 : vector<2x16xf32>
    %73 = arith.subf %65, %72 : vector<2x16xf32>
    %74 = arith.addf %61, %73 : vector<2x16xf32>
    %cst_28 = arith.constant 0.000000e+00 : f32
    %75 = vector.broadcast %cst_28 : f32 to vector<2x16xf32>
    %76 = arith.subf %75, %74 : vector<2x16xf32>
    %77 = arith.mulf %76, %51 : vector<2x16xf32>
    %78 = vector.shape_cast %77 : vector<2x16xf32> to vector<1x2x16xf32>
    %cst_29 = arith.constant dense<0.000000e+00> : vector<1xf32>
    %79 = vector.multi_reduction <add>, %78, %cst_29 [1, 2] : vector<1x2x16xf32> to vector<1xf32>
    %80 = vector.shape_cast %79 : vector<1xf32> to vector<1x1x1xf32>
    %81 = vector.extract %80[0, 0, 0] : f32 from vector<1x1x1xf32>
    %82 = vector.broadcast %81 : f32 to vector<1x1x1xf32>
    %c0_30 = arith.constant 0 : index
    %c0_31 = arith.constant 0 : index
    %c0_32 = arith.constant 0 : index
    %83 = vector.load %arg6[%c0_30, %c0_31, %c0_32] : memref<1x1x1xf32, #tpu.memory_space<vmem>>, vector<1x1x1xf32>
    tpu.vector_store %arg6[%c0_30, %c0_31, %c0_32], %82 {strides = array<i32>} : memref<1x1x1xf32, #tpu.memory_space<vmem>>, vector<1x1x1xf32>,
    %84 = vector.shape_cast %51 : vector<2x16xf32> to vector<1x2x16xf32>
    %cst_33 = arith.constant dense<0.000000e+00> : vector<1xf32>
    %85 = vector.multi_reduction <add>, %84, %cst_33 [1, 2] : vector<1x2x16xf32> to vector<1xf32>
    %86 = vector.shape_cast %85 : vector<1xf32> to vector<1x1x1xf32>
    %87 = vector.extract %86[0, 0, 0] : f32 from vector<1x1x1xf32>
    %88 = vector.broadcast %87 : f32 to vector<1x1x1xf32>
    %c0_34 = arith.constant 0 : index
    %c0_35 = arith.constant 0 : index
    %c0_36 = arith.constant 0 : index
    %89 = vector.load %arg7[%c0_34, %c0_35, %c0_36] : memref<1x1x1xf32, #tpu.memory_space<vmem>>, vector<1x1x1xf32>
    tpu.vector_store %arg7[%c0_34, %c0_35, %c0_36], %88 {strides = array<i32>} : memref<1x1x1xf32, #tpu.memory_space<vmem>>, vector<1x1x1xf32>,
    return
  }
  func.func @transform_0(%arg0: i32) -> (i32, i32) {
    %c0_i32 = arith.constant 0 : i32
    %c0_i32_0 = arith.constant 0 : i32
    %c0_i32_1 = arith.constant 0 : i32
    return %c0_i32, %c0_i32_0 : i32, i32
  }
  func.func @transform_1(%arg0: i32) -> (i32, i32, i32) {
    %c0_i32 = arith.constant 0 : i32
    %c0_i32_0 = arith.constant 0 : i32
    %c0_i32_1 = arith.constant 0 : i32
    %c0_i32_2 = arith.constant 0 : i32
    return %c0_i32, %c0_i32_0, %c0_i32_1 : i32, i32, i32
  }
  func.func @transform_2(%arg0: i32) -> (i32, i32, i32) {
    %c0_i32 = arith.constant 0 : i32
    %c0_i32_0 = arith.constant 0 : i32
    %c0_i32_1 = arith.constant 0 : i32
    %c0_i32_2 = arith.constant 0 : i32
    return %c0_i32, %c0_i32_0, %c0_i32_1 : i32, i32, i32
  }
  func.func @transform_3(%arg0: i32) -> (i32, i32, i32) {
    %c0_i32 = arith.constant 0 : i32
    %c0_i32_0 = arith.constant 0 : i32
    %c0_i32_1 = arith.constant 0 : i32
    return %arg0, %c0_i32, %c0_i32_0 : i32, i32, i32
  }
  func.func @transform_4(%arg0: i32) -> (i32, i32, i32) {
    %c0_i32 = arith.constant 0 : i32
    %c0_i32_0 = arith.constant 0 : i32
    %c0_i32_1 = arith.constant 0 : i32
    return %arg0, %c0_i32, %c0_i32_0 : i32, i32, i32
  }
  func.func @transform_5(%arg0: i32) -> (i32, i32, i32) {
    %c0_i32 = arith.constant 0 : i32
    %c0_i32_0 = arith.constant 0 : i32
    %c0_i32_1 = arith.constant 0 : i32
    return %arg0, %c0_i32, %c0_i32_0 : i32, i32, i32
  }
  func.func @transform_6(%arg0: i32) -> (i32, i32, i32) {
    %c0_i32 = arith.constant 0 : i32
    %c0_i32_0 = arith.constant 0 : i32
    %c0_i32_1 = arith.constant 0 : i32
    return %arg0, %c0_i32, %c0_i32_0 : i32, i32, i32
  }
}

</mosaic_0001>

<bundles_post_ra>
// kernel: tpu_custom_call.1
= control target key start
LH: loop header
LB: loop body
LE: loop exit
PB: predicated region body
PF: predicated region fallthrough
CT: control target
= control target key end

     0   :  { %12 = vsyncpa [#allocation3], 0  ;;  %s1523_s0 = inlined_call_operand.vmem [shape: s32[2,1], index: 0, kind: input, shape index: {}]   ;;  %s1524_s1 = inlined_call_operand.hbm [shape: f32[2,16,32], index: 1, kind: input, shape index: {}]   ;;  %s1525_s2 = inlined_call_operand.hbm [shape: f32[2,16,32], index: 2, kind: input, shape index: {}]   ;;  %s1526_s3 = inlined_call_operand.hbm [shape: f32[4,32,32], index: 3, kind: input, shape index: {}]   ;;  %s1527_s4 = inlined_call_operand.vmem [shape: f32[4,1,32], index: 4, kind: input, shape index: {}]   ;;  %s1528_s5 = inlined_call_operand.vmem [shape: f32[4,1,1], index: 5, kind: output, shape index: {0}]   ;;  %s1529_s6 = inlined_call_operand.vmem [shape: f32[4,1,1], index: 6, kind: output, shape index: {1}]  }
   0x1   :  { %13 = vsyncpa [#allocation5], 0  ;;  %s1265_s21 = smov 0   ;;  %s1267_s22 = smov 0  }
   0x2   :  { %s1269_s23 = smov 0   ;;  %s1271_s24 = smov 0  }
   0x3 LB: > { %s1284_s25 = sadd.s32 4294967295, %s1221_s24   ;;  %s1287_s26 = sadd.s32 1, %s1221_s24   ;;  %s1221_s24 = sphi %s1271_s24, %s1546_s24   ;;  %s1217_s23 = sphi %s1269_s23, %s1545_s23   ;;  %s1213_s22 = sphi %s1267_s22, %s1544_s22   ;;  %s1209_s21 = sphi %s1265_s21, %s1543_s21  }
   0x4   : > { %s86_s27 = ssub.s32 %s1221_s24, %s1287_s26  ;;  %s89_s28 = sadd.s32 1, %s1217_s23 }
   0x5   : > { %p87_p0 = scmp.eq.s32.totalorder %s86_s27, 0  ;;  %p96_p1 = scmp.ne.s32.totalorder %s1217_s23, %s1213_s22 }
   0x6   : > { %p97_p2 = scmp.eq.s32.totalorder %s1221_s24, 0  ;;  %p102_p3 = scmp.ne.s32.totalorder %s1213_s22, %s1209_s21 }
   0x7   : > { %s1297_s29 = scalar_select %p87_p0, %s1217_s23, %s89_s28  }
   0x8   : > { %p98_p4 = por %p97_p2, %p96_p1  ;;  %p1530_p5 = scmp.eq.s32.totalorder %s1284_s25, 0 }
   0x9   : > { %p935_p6 = scmp.ge.s32.totalorder %s1221_s24, 1  ;;  %p191_p7 = scmp.lt.s32.totalorder %s1221_s24, 5 }
   0xa   : > { %p1304_p8 = por %p1530_p5, %p102_p3  ;;  %s1223_s8 = smov [#allocation2]  }
   0xb   : > { %p1308_p9 = pnand %p935_p6, %p191_p7  ;;  %s206_s9 = sshll.u32 %s1223_s8, 4  ;;  %s207_s9 = int_to_ptr.vmem [resolvable:$true] %s206_s9 }
   0xc   : > { %s1533_s30 = scalar_select %p1304_p8, 1, 0 }
   0xd   : > { %s1534_s7 = scalar_select %p1308_p9, 1, 0 }
   0xe   : > { %p1011_p10 = pneg %p1308_p9  ;;  %p1024_p12 = scmp.lt.s32.totalorder %s1221_s24, 4 }
   0xf   : > { %s1110_s12 = scalar_lea.vmem %s207_s9, 512  ;;  %p1118_p6 = scmp.lt.s32.totalorder %s207_s9, %s207_s9 }
  0x10   : > { %p1316_p11 = pnand %p1011_p10, %p1530_p5  ;;  %p1321_p13 = pnand %p1024_p12, %p98_p4 }
  0x11   : > { %p1111_p1 = scmp.ne.s32.totalorder %s207_s9, %s1110_s12  ;;  %p1119_p7 = scmp.lt.s32.totalorder %s1110_s12, %s1110_s12 }
  0x12   : > { %p1101_p0 = pneg %p1316_p11 }
  0x13   : > { %p1120_p10 = por %p1119_p7, %p1118_p6 }
  0x14   : > { %p1113_p2 = pnand %p1111_p1, %p1101_p0 }
  0x16   : > { %p1114_p3 = pneg %p1113_p2 }
  0x18   : > { %p1121_p5 = pnand %p1120_p10, %p1114_p3 }
  0x1a   : > { %1124 = shalt.err (!%p1121_p5)
}
  0x1b   : > { %s1224_s13 = smov 128   ;;  %s1225_s14 = smov 8  }
  0x1c   : > { %1014 = dma.hbm_to_vmem [thread:$0]  (!%p1316_p11), %s1524_s1, 512, %s207_s9, [#allocation3], %s1224_s13, %s1224_s13, %s1225_s14  }
  0x1d   : > { %s1226_s17 = smov [#allocation4]   ;;  %s233_s19 = sand.u32 1, %s1221_s24  }
  0x1e   : > { %s219_s18 = sshll.u32 %s1226_s17, 4  ;;  %s220_s18 = int_to_ptr.vmem [resolvable:$true] %s219_s18 }
  0x1f   : > { %s1136_s20 = scalar_lea.vmem %s220_s18, 512  ;;  %p1144_p1 = scmp.lt.s32.totalorder %s220_s18, %s220_s18 }
  0x20   : > { %p1137_p4 = scmp.ne.s32.totalorder %s220_s18, %s1136_s20  ;;  %p1145_p2 = scmp.lt.s32.totalorder %s1136_s20, %s1136_s20 }
  0x22   : > { %p1139_p5 = pnand %p1137_p4, %p1101_p0  ;;  %p1146_p3 = por %p1145_p2, %p1144_p1 }
  0x24   : > { %p1140_p12 = pneg %p1139_p5 }
  0x26   : > { %p1147_p6 = pnand %p1146_p3, %p1140_p12 }
  0x28   : > { %1150 = shalt.err (!%p1147_p6)
}
  0x29   : > { %1017 = dma.hbm_to_vmem [thread:$0]  (!%p1316_p11), %s1525_s2, 512, %s220_s18, [#allocation5], %s1224_s13, %s1224_s13, %s1225_s14  }
  0x2a   : > { %s235_s28 = sand.u32 1, %s1217_s23   ;;  %s962_s8 = sshll.u32 %s1221_s24, 9 }
  0x2b   : > { %s939_s9 = sshll.u32 %s235_s28, 5  ;;  %s1355_s16 = scalar_lea.hbm %s1526_s3, %s962_s8 }
  0x2c   : > { %s237_s10 = scalar_lea.vmem [#allocation6], %s939_s9  ;;  %s1359_s20 = scalar_lea.sflag [#allocation3], %s233_s19 }
  0x2d   : > { %s244_s17 = sshll.u32 %s237_s10, 4  ;;  %s1151_s21 = scalar_lea.hbm %s1355_s16, 512  ;;  %s1357_s17 = int_to_ptr.vmem [resolvable:$true] %s244_s17 }
  0x2e   : > { %p1152_p0 = scmp.ne.s32.totalorder %s1355_s16, %s1151_s21  ;;  %p1153_p11 = pneg %p1321_p13 }
  0x2f   : > { %s1156_s27 = scalar_lea.hbm %s1526_s3, 2048  ;;  %p1157_p4 = scmp.lt.s32.totalorder %s1355_s16, %s1526_s3 }
  0x30   : > { %p1154_p7 = pnand %p1153_p11, %p1152_p0  ;;  %p1158_p5 = scmp.lt.s32.totalorder %s1156_s27, %s1151_s21 }
  0x32   : > { %p1155_p10 = pneg %p1154_p7  ;;  %p1159_p12 = por %p1158_p5, %p1157_p4 }
  0x34   : > { %p1160_p1 = pnand %p1159_p12, %p1155_p10 }
  0x36   : > { %1163 = shalt.err (!%p1160_p1)
}
  0x37   : > { %s1164_s19 = scalar_lea.vmem %s1357_s17, 512  ;;  %s1227_s9 = smov [#allocation6]  }
  0x38   : > { %p1165_p2 = scmp.ne.s32.totalorder %s1357_s17, %s1164_s19  ;;  %s1169_s12 = sshll.u32 %s1227_s9, 4  ;;  %s1170_s12 = int_to_ptr.vmem [resolvable:$false] %s1169_s12 }
  0x39   : > { %s1171_s15 = scalar_lea.vmem %s1170_s12, 1024  ;;  %p1172_p0 = scmp.lt.s32.totalorder %s1357_s17, %s1170_s12 }
  0x3a   : > { %p1167_p3 = pnand %p1165_p2, %p1153_p11  ;;  %p1173_p7 = scmp.lt.s32.totalorder %s1171_s15, %s1164_s19 }
  0x3c   : > { %p1168_p6 = pneg %p1167_p3  ;;  %p1174_p8 = por %p1173_p7, %p1172_p0 }
  0x3e   : > { %p1175_p9 = pnand %p1174_p8, %p1168_p6 }
  0x40   : > { %1178 = shalt.err (!%p1175_p9)
}
  0x41   : > { %1021 = dma.hbm_to_vmem [thread:$0]  (!%p1321_p13), %s1355_s16, 512, %s1357_s17, %s1359_s20, %s1224_s13, %s1224_s13, %s1225_s14  }
  0x42   : > { %p1537_p11 = scmp.ne.s32.totalorder %s1534_s7, 0 }
  0x43   : > { %p1538_p10 = scmp.eq.s32.totalorder (!%p1537_p11), %s1284_s25, 0 }
  0x44   : > { %262 = sbr.rel (%p1537_p11) target bundleno = 1030 (0x406), region = 40 }
  0x49   : > { %1196 = dma.done.wait (%p1538_p10), [#allocation3], 512   ;;  %p1539_p4 = pmov %p1538_p10 }
  0x4b   : > { %1198 = vsyncadd (%p1539_p4), [#allocation3], 4294966784  ;;  %p1540_p8 = pmov %p1539_p4 }
  0x4c   : > { %p1541_p9 = pmov %p1539_p4 }
  0x4d   : > { %1200 = dma.done.wait (%p1540_p8), [#allocation5], 512  }
  0x4e   : > { %1202 = vsyncadd (%p1541_p9), [#allocation5], 4294966784  ;;  %s272_s11 = sand.u32 1, %s1284_s25   ;;  %s274_s13 = sand.u32 1, %s1213_s22  }
  0x4f   : > { %s945_s14 = sshll.u32 %s274_s13, 5  ;;  %s273_s7 = scalar_lea.sflag [#allocation3], %s272_s11 }
  0x50   : > { %s276_s16 = scalar_lea.vmem [#allocation6], %s945_s14  ;;  %p1542_p13 = scmp.ne.s32.totalorder %s1533_s30, 0 }
  0x52   : > { %1204 = dma.done.wait (%p1542_p13), %s273_s7, 512  }
  0x53   : > { %1206 = vsyncadd (%p1542_p13), %s273_s7, 4294966784  ;;  %v322_v0 = vld [vmem:[%s276_s16 + $0x10] sm:$0xff]  ;;  %v323_v1 = vld [vmem:[%s276_s16 + $0x18] sm:$0xff]  ;;  %vm339_vm0 = vcmask 261120   ;;  %v1228_v17 = vmov 0   ;;  %p309_p5 = scmp.lt.s32.totalorder %s1284_s25, 3  ;;  %v573_v27 = vlaneseq }
  0x54   : > { %v320_v2 = vld [vmem:[%s276_s16] sm:$0xff]  ;;  %v325_v3 = vpack.c.bf16 %v323_v1, %v322_v0  ;;  %v321_v4 = vld [vmem:[%s276_s16 + $0x8] sm:$0xff]  ;;  %v329_v9 = vld [vmem:[#allocation2 + $0x10] sm:$0xff]  ;;  %1065 = vset.pattern.permute.xlu0 %v1228_v17  ;;  %1066 = vset.pattern.permute.xlu1 %v1228_v17  ;;  %s319_s18 = sadd.s32 1, %s1284_s25  ;;  %vm601_vm4 = vcmask 130048   ;;  %v1229_v59 = vmov 0.0  }
  0x55   : > { %v327_v5 = vld [vmem:[#allocation2] sm:$0xff]  ;;  %v328_v6 = vld [vmem:[#allocation2 + $0x8] sm:$0xff]  ;;  %v324_v7 = vpack.c.bf16 %v321_v4, %v320_v2  ;;  %v330_v10 = vld [vmem:[#allocation2 + $0x18] sm:$0xff]  ;;  %s1414_s17 = scalar_select %p309_p5, %s1284_s25, 3  ;;  %v1424_v28 = vshrl.u32 %v573_v27, 7  ;;  %v1427_v32 = vand.u32 127, %v573_v27  ;;  %v578_v41 = vstv %s319_s18 }
  0x56   : > { %v331_v8 = vpack.c.bf16 %v328_v6, %v327_v5  ;;  %975 = vmatprep.subr.bf16.mxu0 %v325_v3  ;;  %v398_v11 = vld [vmem:[#allocation4 + $0x18] sm:$0xff]  ;;  %v332_v12 = vpack.c.bf16 %v330_v10, %v329_v9  ;;  %v396_v13 = vld [vmem:[#allocation4 + $0x8] sm:$0xff]  ;;  %v397_v14 = vld [vmem:[#allocation4 + $0x10] sm:$0xff]  ;;  %vm796_vm8 = vcmask 123904   ;;  %vm782_vm9 = vcmask 130112  }
  0x57   : > { %976 = vmatpush3.bf16.msra.mxu0 %v325_v3  ;;  %983 = vmatprep.subr.msk.mxu1 %vm339_vm0, %v396_v13  ;;  %v395_v15 = vld [vmem:[#allocation4] sm:$0xff]  ;;  %s311_s24 = scalar_lea.vmem %s1527_s4, %s1414_s17  ;;  %v575_v29 = vadd.s32 8, %v1424_v28  ;;  %v583_v33 = vadd.s32 5, %v1424_v28  ;;  %v579_v48 = vadd.s32 %v578_v41, %v1424_v28  ;;  %v634_v53 = vadd.s32 %v578_v41, %v1427_v32  ;;  %s314_s28 = scalar_lea.vmem %s1528_s5, %s1414_s17 }
  0x58   : > { %979 = vmatprep.mubr.msk.bf16.mxu0 %vm339_vm0, %v331_v8  ;;  %977 = vmatprep.subr.bf16.mxu0 %v324_v7  ;;  %v635_v16 = vld [vmem:[%s1523_s0] sm:$0x3]  ;;  %v729_v57 = vsub.s32 0, %v1424_v28  ;;  %v740_v0 = vsub.s32 1, %v1424_v28  ;;  %vm793_vm10 = vcmask 1041409   ;;  %vm808_vm11 = vcmask 0   ;;  %s317_s12 = scalar_lea.vmem %s1529_s6, %s1414_s17 }
  0x59   : > { %984 = vmatpush3.xpose.msk.msra.mxu1 %vm339_vm0, %v396_v13  ;;  %637 = vperm.xlu0 %1065, %v635_v16   ;;  %v946_v18 = vld [vmem:[%s311_s24] ss:$0 sm:$0xff]  ;;  %v584_v30 = vadd.s32 5, %v575_v29  ;;  %vm591_vm2 = vcmp.eq.s32.totalorder %v1427_v32, %v583_v33  ;;  %v580_v46 = vadd.s32 %v578_v41, %v575_v29  ;;  %vm581_vm6 = vcmp.eq.s32.totalorder %v1427_v32, %v579_v48 }
  0x5a   : > { %985 = vmatprep.subr.msk.mxu1 %vm339_vm0, %v395_v15 }
  0x5b   : > { %978 = vmatpush3.bf16.msra.mxu0 %v324_v7  ;;  %v958_v31 = vadd.s32 4294967280, %v584_v30  ;;  %vm586_vm1 = vcmp.ge.s32.totalorder %v584_v30, 16  ;;  %vm582_vm5 = vcmp.eq.s32.totalorder %v1427_v32, %v580_v46 }
  0x5c   : > { %990 = vmatprep.subr.msk.mxu0 %vm339_vm0, %v398_v11 }
  0x5d   : > { %986 = vmatpush3.xpose.msk.msra.mxu1 %vm339_vm0, %v395_v15  ;;  %v590_v34 = vsel %vm586_vm1, %v958_v31, %v584_v30 }
  0x5e   : > { %980 = vmatmul.mubr.msk.bf16.vlgmr.msra.gmra.mxu0 %vm339_vm0, %v332_v12  ;;  %vm592_vm3 = vcmp.eq.s32.totalorder %v1427_v32, %v590_v34 }
  0x5f   : > { %991 = vmatpush3.xpose.msk.msra.mxu0 %vm339_vm0, %v398_v11 }
  0x60   : > { %992 = vmatprep.subr.msk.mxu0 %vm339_vm0, %v397_v14 }
  0x63   : > { %993 = vmatpush3.xpose.msk.msra.mxu0 %vm339_vm0, %v397_v14 }
  0xd4   : > { %v638_v54 = vpop.permute.xlu0 %637 }
  0xd5   : > { %vm639_vm7 = vcmp.lt.s32.totalorder %v634_v53, %v638_v54 }
  0xd6   : > { %v1447_v60 = vsel %vm639_vm7, 1.0, %v1229_v59 }
  0xd7   : > { %v730_v62 = vrot.slane %v1447_v60, %v729_v57  ;;  %v741_v1 = vrot.slane %v1447_v60, %v740_v0 }
 0x11e   : > { %v981_v19 = vpop.f32.mrf.mxu0 }
 0x11f   : > { %v389_v20 = vadd.f32 %v981_v19, %v946_v18 }
 0x120   : > { %v380_v21 = vpop.f32.mrf.mxu0 }
 0x121   : > { %v381_v22 = vadd.f32 %v946_v18, %v380_v21  ;;  %994 = vmatprep.mubr.msk.f32.mxu0 %vm339_vm0, %v389_v20 }
 0x122   : > { %v982_v23 = vpop.f32.mrf.mxu0 }
 0x123   : > { %v392_v24 = vadd.f32 %v982_v23, %v946_v18  ;;  %987 = vmatprep.mubr.msk.f32.mxu1 %vm339_vm0, %v381_v22 }
 0x124   : > { %v383_v25 = vpop.f32.mrf.mxu0 }
 0x125   : > { %v384_v26 = vadd.f32 %v946_v18, %v383_v25  ;;  %995 = vmatmul.mubr.msk.f32.vlgmr.msra.gmra.mxu0 %vm339_vm0, %v392_v24 }
 0x127   : > { %988 = vmatmul.mubr.msk.f32.vlgmr.msra.gmra.mxu1 %vm339_vm0, %v384_v26 }
 0x1e5   : > { %v996_v35 = vpop.f32.mrf.mxu0 }
 0x1e6   : > { %v621_v47 = vsel %vm592_vm3, %v996_v35, 0.0  ;;  %v600_v61 = vsel %vm582_vm5, %v996_v35, 0.0 }
 0x1e7   : > { %v989_v36 = vpop.f32.mrf.mxu1  ;;  %v564_v37 = vpop.f32.mrf.mxu0  ;;  %v631_v49 = vsel %vm601_vm4, %v621_v47, 0.0  ;;  %v611_v63 = vsel %vm601_vm4, %v600_v61, 0.0 }
 0x1e8   : > { %v619_v38 = vsel %vm592_vm3, %v989_v36, 0.0  ;;  %v620_v42 = vsel %vm591_vm2, %v564_v37, 0.0  ;;  %v598_v50 = vsel %vm582_vm5, %v989_v36, 0.0  ;;  %v599_v52 = vsel %vm581_vm6, %v564_v37, 0.0 }
 0x1e9   : > { %v477_v39 = vpop.f32.mrf.mxu1  ;;  %v625_v40 = vsel %vm601_vm4, %v619_v38, 0.0  ;;  %v628_v45 = vsel %vm601_vm4, %v620_v42, 0.0  ;;  %v605_v51 = vsel %vm601_vm4, %v598_v50, 0.0  ;;  %v608_v55 = vsel %vm601_vm4, %v599_v52, 0.0 }
 0x1ea   : > { %v618_v43 = vsel %vm591_vm2, %v477_v39, 0.0  ;;  %626 = vadd.xlane.f32.xlu1 %v625_v40  ;;  %v597_v56 = vsel %vm581_vm6, %v477_v39, 0.0 }
 0x1eb   : > { %v622_v44 = vsel %vm601_vm4, %v618_v43, 0.0  ;;  %v602_v58 = vsel %vm601_vm4, %v597_v56, 0.0 }
 0x1ec   : > { %623 = vadd.xlane.f32.xlu0 %v622_v44 }
 0x1ee   : > { %629 = vadd.xlane.f32.xlu1 %v628_v45 }
 0x1f2   : > { %632 = vadd.xlane.f32.xlu1 %v631_v49 }
 0x1f6   : > { %606 = vadd.xlane.f32.xlu1 %v605_v51 }
 0x1fa   : > { %609 = vadd.xlane.f32.xlu1 %v608_v55 }
 0x1fe   : > { %603 = vadd.xlane.f32.xlu1 %v602_v58 }
 0x202   : > { %612 = vadd.xlane.f32.xlu1 %v611_v63  ;;  %736 = vbcast.lane.b32.xlu0 %v730_v62, 264 }
 0x213   : > { %732 = vbcast.lane.b32.xlu1 %v730_v62, 256 }
 0x217   : > { %743 = vbcast.lane.b32.xlu1 %v741_v1, 256 }
 0x21b   : > { %747 = vbcast.lane.b32.xlu1 %v741_v1, 264 }
 0x273   : > { %v1455_v2 = vpop.xlane.xlu1 %626 }
 0x274   : > { %v679_v3 = vsub.f32 0.0, %v1455_v2 }
 0x275   : > { %v1458_v4 = vpop.xlane.xlu0 %623 }
 0x276   : > { %v687_v5 = vand.u32 2147483647, %v679_v3  ;;  %v678_v6 = vsub.f32 0.0, %v1458_v4  ;;  %v683_v59 = vmin.f32 %v679_v3, 0.0 }
 0x277   : > { %v1463_v7 = vpop.xlane.xlu1 %629 }
 0x278   : > { %v691_v8 = vsub.f32 0.0, %v687_v5  ;;  %v680_v9 = vsub.f32 0.0, %v1463_v7  ;;  %v686_v10 = vand.u32 2147483647, %v678_v6  ;;  %v682_v2 = vmin.f32 %v678_v6, 0.0 }
 0x27a   : > { %v696_v11 = vmul.f32 1.442695, %v691_v8  ;;  %v688_v12 = vand.u32 2147483647, %v680_v9  ;;  %v690_v15 = vsub.f32 0.0, %v686_v10 }
 0x27b   : > { %v1470_v13 = vpop.xlane.xlu1 %632 }
 0x27c   : > { %v681_v14 = vsub.f32 0.0, %v1470_v13  ;;  %1067 = vpow2.f32 %v696_v11  ;;  %v692_v17 = vsub.f32 0.0, %v688_v12  ;;  %v694_v20 = vmul.f32 1.442695, %v690_v15  ;;  %v737_v12 = vpop.permute.xlu0 %736 }
 0x27d   : > { %v810_v13 = vsel %vm796_vm8, %v1447_v60, 0.0 }
 0x27e   : > { %v689_v16 = vand.u32 2147483647, %v681_v14  ;;  %v698_v23 = vmul.f32 1.442695, %v692_v17  ;;  %1069 = vpow2.f32 %v694_v20 }
 0x27f   : > { %v607_v18 = vpop.xlane.xlu1 %606 }
 0x280   : > { %v647_v19 = vand.u32 2147483647, %v607_v18  ;;  %v693_v21 = vsub.f32 0.0, %v689_v16  ;;  %v643_v61 = vmin.f32 %v607_v18, 0.0 }
 0x282   : > { %v651_v22 = vsub.f32 0.0, %v647_v19  ;;  %v700_v27 = vmul.f32 1.442695, %v693_v21 }
 0x283   : > { %v1475_v24 = vpop.xlane.xlu1 %609 }
 0x284   : > { %v656_v25 = vmul.f32 1.442695, %v651_v22  ;;  %v648_v26 = vand.u32 2147483647, %v1475_v24  ;;  %v644_v20 = vmin.f32 %v1475_v24, 0.0  ;;  %v684_v22 = vmin.f32 %v680_v9, 0.0 }
 0x285   : > { %v685_v24 = vmin.f32 %v681_v14, 0.0  ;;  %v777_v14 = vadd.s32 4294967288, %v1427_v32 }
 0x286   : > { %1071 = vpow2.f32 %v656_v25  ;;  %v652_v29 = vsub.f32 0.0, %v648_v26 }
 0x287   : > { %1073 = vpow2.f32 %v698_v23  ;;  %v1478_v30 = vpop.xlane.xlu1 %603 }
 0x288   : > { %v658_v31 = vmul.f32 1.442695, %v652_v29  ;;  %v646_v33 = vand.u32 2147483647, %v1478_v30  ;;  %1075 = vpow2.f32 %v700_v27  ;;  %v642_v25 = vmin.f32 %v1478_v30, 0.0 }
 0x289   : > { %v1068_v35 = vpop.eup %1067 }
 0x28a   : > { %1077 = vpow2.f32 %v658_v31  ;;  %v650_v34 = vsub.f32 0.0, %v646_v33  ;;  %v703_v39 = vadd.f32 1.0, %v1068_v35 }
 0x28b   : > { %v1481_v36 = vpop.xlane.xlu1 %612  ;;  %v1070_v42 = vpop.eup %1069 }
 0x28c   : > { %v654_v37 = vmul.f32 1.442695, %v650_v34  ;;  %v649_v38 = vand.u32 2147483647, %v1481_v36  ;;  %v702_v46 = vadd.f32 1.0, %v1070_v42  ;;  %v645_v4 = vmin.f32 %v1481_v36, 0.0 }
 0x28d   : > { %v775_v36 = vsub.s32 %v1427_v32, %v1424_v28 }
 0x28e   : > { %1079 = vpow2.f32 %v654_v37  ;;  %v653_v40 = vsub.f32 0.0, %v649_v38 }
 0x28f   : > { %1081 = vlog2.f32 %v703_v39  ;;  %v733_v3 = vpop.permute.xlu1 %732 }
 0x290   : > { %v660_v41 = vmul.f32 1.442695, %v653_v40 }
 0x292   : > { %1083 = vpow2.f32 %v660_v41 }
 0x293   : > { %v1072_v43 = vpop.eup %1071  ;;  %v744_v7 = vpop.permute.xlu1 %743 }
 0x294   : > { %v1074_v44 = vpop.eup %1073  ;;  %v663_v45 = vadd.f32 1.0, %v1072_v43 }
 0x295   : > { %v1076_v47 = vpop.eup %1075  ;;  %v704_v49 = vadd.f32 1.0, %v1074_v44 }
 0x296   : > { %1085 = vlog2.f32 %v663_v45  ;;  %v705_v51 = vadd.f32 1.0, %v1076_v47 }
 0x297   : > { %v1078_v48 = vpop.eup %1077  ;;  %1087 = vlog2.f32 %v702_v46  ;;  %v748_v43 = vpop.permute.xlu1 %747 }
 0x298   : > { %v664_v50 = vadd.f32 1.0, %v1078_v48  ;;  %v780_v48 = vsub.s32 %v777_v14, %v1424_v28 }
 0x29a   : > { %1089 = vlog2.f32 %v664_v50 }
 0x29b   : > { %1091 = vlog2.f32 %v704_v49  ;;  %v1080_v52 = vpop.eup %1079 }
 0x29c   : > { %v662_v53 = vadd.f32 1.0, %v1080_v52  ;;  %1093 = vlog2.f32 %v705_v51  ;;  %v1082_v54 = vpop.eup %1081 }
 0x29d   : > { %v709_v57 = vmul.f32 0.6931472, %v1082_v54 }
 0x29e   : > { %1095 = vlog2.f32 %v662_v53 }
 0x29f   : > { %v1084_v55 = vpop.eup %1083  ;;  %v715_v0 = vsub.f32 %v683_v59, %v709_v57 }
 0x2a0   : > { %v665_v56 = vadd.f32 1.0, %v1084_v55 }
 0x2a2   : > { %1097 = vlog2.f32 %v665_v56 }
 0x2a3   : > { %v1086_v58 = vpop.eup %1085 }
 0x2a4   : > { %v669_v62 = vmul.f32 0.6931472, %v1086_v58  ;;  %v1088_v63 = vpop.eup %1087 }
 0x2a5   : > { %v707_v17 = vmul.f32 0.6931472, %v1088_v63 }
 0x2a6   : > { %v675_v1 = vsub.f32 %v643_v61, %v669_v62 }
 0x2a7   : > { %v1090_v5 = vpop.eup %1089  ;;  %v714_v27 = vsub.f32 %v682_v2, %v707_v17 }
 0x2a8   : > { %v1092_v8 = vpop.eup %1091  ;;  %v719_v10 = vadd.f32 %v715_v0, %v675_v1  ;;  %v671_v11 = vmul.f32 0.6931472, %v1090_v5 }
 0x2a9   : > { %v1094_v16 = vpop.eup %1093  ;;  %v711_v19 = vmul.f32 0.6931472, %v1092_v8 }
 0x2aa   : > { %v723_v15 = vsub.f32 0.0, %v719_v10  ;;  %v676_v23 = vsub.f32 %v644_v20, %v671_v11  ;;  %v713_v31 = vmul.f32 0.6931472, %v1094_v16 }
 0x2ab   : > { %v1096_v21 = vpop.eup %1095  ;;  %v716_v29 = vsub.f32 %v684_v22, %v711_v19 }
 0x2ac   : > { %v754_v18 = vmul.f32 %v737_v12, %v723_v15  ;;  %v667_v26 = vmul.f32 0.6931472, %v1096_v21  ;;  %v717_v9 = vsub.f32 %v685_v24, %v713_v31 }
 0x2ad   : > { %v720_v37 = vadd.f32 %v716_v29, %v676_v23 }
 0x2ae   : > { %765 = vperm.xlu0 %1065, %v754_v18   ;;  %v674_v33 = vsub.f32 %v642_v25, %v667_v26 }
 0x2af   : > { %v1098_v34 = vpop.eup %1097  ;;  %v724_v40 = vsub.f32 0.0, %v720_v37 }
 0x2b0   : > { %v673_v6 = vmul.f32 0.6931472, %v1098_v34  ;;  %v718_v35 = vadd.f32 %v714_v27, %v674_v33 }
 0x2b1   : > { %v755_v44 = vmul.f32 %v744_v7, %v724_v40 }
 0x2b2   : > { %v677_v38 = vsub.f32 %v645_v4, %v673_v6  ;;  %v722_v39 = vsub.f32 0.0, %v718_v35 }
 0x2b4   : > { %v753_v30 = vmul.f32 %v733_v3, %v722_v39  ;;  %v721_v41 = vadd.f32 %v717_v9, %v677_v38 }
 0x2b6   : > { %v725_v42 = vsub.f32 0.0, %v721_v41  ;;  %762 = vperm.xlu1 %1066, %v753_v30  }
 0x2b8   : > { %v756_v45 = vmul.f32 %v748_v43, %v725_v42 }
 0x2ba   : > { %768 = vperm.xlu1 %1066, %v755_v44   ;;  %771 = vperm.xlu0 %1065, %v756_v45  }
 0x2d9   : > { %811 = vadd.xlane.f32.xlu0 %v810_v13 }
 0x329   : > { %v766_v46 = vpop.permute.xlu0 %765 }
 0x32a   : > { %v781_v52 = vrot.slane %v766_v46, %v780_v48 }
 0x331   : > { %v763_v47 = vpop.permute.xlu1 %762 }
 0x332   : > { %v776_v49 = vrot.slane %v763_v47, %v775_v36 }
 0x334   : > { %v783_v55 = vsel %vm782_vm9, %v781_v52, %v776_v49 }
 0x335   : > { %v772_v50 = vpop.permute.xlu0 %771  ;;  %v769_v51 = vpop.permute.xlu1 %768 }
 0x336   : > { %v791_v53 = vrot.slane %v772_v50, %v780_v48  ;;  %v787_v54 = vrot.slane %v769_v51, %v775_v36 }
 0x338   : > { %v792_v60 = vsel %vm782_vm9, %v791_v53, %v787_v54 }
 0x339   : > { %v794_v56 = vsel %vm793_vm10, %v792_v60, %v783_v55 }
 0x33a   : > { %v797_v57 = vsel %vm796_vm8, %v794_v56, 0.0 }
 0x33b   : > { %798 = vadd.xlane.f32.xlu1 %v797_v57 }
 0x362   : > { %v812_v58 = vpop.xlane.xlu0 %811 }
 0x363   : > { %v813_v32 = vrot.slane %v812_v58, 4 }
 0x365   : > { %v814_v59 = vadd.f32 %v813_v32, %v812_v58 }
 0x367   : > { %v815_v61 = vrot.slane %v814_v59, 2 }
 0x369   : > { %v816_v0 = vadd.f32 %v815_v61, %v814_v59 }
 0x36b   : > { %v817_v8 = vrot.slane %v816_v0, 1 }
 0x36d   : > { %v818_v12 = vadd.f32 %v817_v8, %v816_v0 }
 0x3c4   : > { %v799_v28 = vpop.xlane.xlu1 %798 }
 0x3c5   : > { %v800_v62 = vrot.slane %v799_v28, 4 }
 0x3c7   : > { %v801_v63 = vadd.f32 %v800_v62, %v799_v28 }
 0x3c9   : > { %v802_v1 = vrot.slane %v801_v63, 2 }
 0x3cb   : > { %v803_v5 = vadd.f32 %v802_v1, %v801_v63 }
 0x3cd   : > { %v804_v10 = vrot.slane %v803_v5, 1 }
 0x3cf   : > { %v805_v11 = vadd.f32 %v804_v10, %v803_v5 }
 0x3d1   : > { %997 = vpush %v805_v11 }
 0x3d2   : > { %999 = vpush %v818_v12 }
 0x402   : > { %s998_s8 = spop %997 }
 0x403   : > { %v807_v15 = vstv %s998_s8  ;;  %s1000_s15 = spop %999 }
 0x404   : > { %809 = vst.msk [vmem:[%s314_s28] sm:$0x1] %vm808_vm11, %v807_v15  ;;  %v820_v16 = vstv %s1000_s15 }
 0x405   : > { %821 = vst.msk [vmem:[%s317_s12] sm:$0x1] %vm808_vm11, %v820_v16 }
 0x406 PF: > { %p16_p12 = scmp.ge.s32.totalorder %s1287_s26, 6   ;;  %s1543_s21 = smov %s1213_s22 }
 0x407   : > { %s1544_s22 = smov %s1217_s23  ;;  %s1545_s23 = smov %s1297_s29 }
 0x408   : > { %s1546_s24 = smov %s1287_s26  ;;  %18 = sbr.rel (!%p16_p12) target bundleno = 3 (0x3), region = 102 }
 0x40d   :  { %851 = vsyncpa [#allocation3], 1 }
 0x40e   :  { %853 = vsyncpa [#allocation3 + $0x1], 1 }
 0x40f   :  { %854 = vsyncpa [#allocation5], 1 }

</bundles_post_ra>
